<compile_context>
chip_gen: v5e
topology: v5e:2x2
jax: 0.10.0
libtpu: 0.0.40
codegen_flags: <defaults>
</compile_context>

<pallas_src>
import functools

import jax
import jax.numpy as jnp
from jax import lax
from jax.experimental import pallas as pl
from jax.experimental.pallas import tpu as pltpu

_LANES = 128
# ~1 MiB per input block: measured streaming kernels saturate HBM by ~0.5-4 MiB
# tiles; bigger tiles only add un-overlapped warm-up/drain and VMEM pressure.
_MAX_BLOCK_BYTES = 1 << 20
_MAX_BLOCK_ROWS = 1024  # also bounds the static sublane-group unroll below


def _num_tc_splits():
    """2 on chips with two TensorCores per JAX device (v4/v5p/v7x), else 1."""
    try:
        kind = jax.devices()[0].device_kind.lower()
    except Exception:
        return 1
    if any(tag in kind for tag in ("v7", "7x", "v4", "v5p")):
        return 2
    return 1


def _rmse_partial_kernel(yhat_ref, y_ref, out_ref, acc_ref, *,
                         n_blocks, valid_rows_last):
    """Per-lane partial sums of (yhat - y)^2.

    Grid = (splits, kt).  Split c owns blocks [c*kt, (c+1)*kt); overflow block
    ids (index_map min-clamped duplicates) are skipped.  Each split keeps an
    (8, cols) f32 accumulator in VMEM and writes its own (1, 8, cols) partial
    on its last grid step; all cross-sublane / cross-lane reduction happens on
    that tiny partial in the wrapper.
    """
    c = pl.program_id(0)
    k = pl.program_id(1)
    kt = pl.num_programs(1)
    block_id = c * kt + k
    block_rows, cols = yhat_ref.shape
    nsub = block_rows // 8  # static

    @pl.when(k == 0)
    def _init():
        acc_ref[...] = jnp.zeros_like(acc_ref)

    @pl.when(block_id < n_blocks)
    def _accumulate():
        d = yhat_ref[...].astype(jnp.float32) - y_ref[...].astype(jnp.float32)
        dd = d * d
        if valid_rows_last < block_rows:
            # Only the final block can contain padded (garbage) rows; mask them.
            ridx = lax.broadcasted_iota(jnp.int32, dd.shape, 0)
            keep = jnp.logical_or(block_id < n_blocks - 1,
                                  ridx < valid_rows_last)
            dd = jnp.where(keep, dd, 0.0)
        # Pure per-vreg VALU accumulation over sublane groups (no XLU reduce).
        part = dd[0:8, :]
        for i in range(1, nsub):
            part = part + dd[i * 8:(i + 1) * 8, :]
        acc_ref[...] += part

    @pl.when(k == kt - 1)
    def _finalize():
        out_ref[...] = acc_ref[...].reshape(out_ref.shape)


def _partial_sq_sum(yhat2d, y2d, block_rows=None, num_splits=None):
    """Pallas partial sums over a (rows, cols) view -> (splits, 8, cols) f32."""
    rows, cols = yhat2d.shape
    assert cols % _LANES == 0 and rows >= 1
    itemsize_pair = yhat2d.dtype.itemsize + y2d.dtype.itemsize

    if block_rows is None:
        per_elem = max(yhat2d.dtype.itemsize, y2d.dtype.itemsize)
        block_rows = _MAX_BLOCK_BYTES // (cols * per_elem)
        block_rows = min(block_rows, _MAX_BLOCK_ROWS, rows)
    # Sublane-pack-friendly alignment for the narrower input dtype
    # (8 rows for f32, 16 for bf16, 32 for fp8).
    min_isz = min(yhat2d.dtype.itemsize, y2d.dtype.itemsize)
    align = 8 * max(1, 4 // max(1, min_isz))
    block_rows = (int(block_rows) // align) * align
    block_rows = max(block_rows, align)

    n_blocks = int(pl.cdiv(rows, block_rows))
    valid_rows_last = rows - (n_blocks - 1) * block_rows

    splits = num_splits if num_splits is not None else _num_tc_splits()
    splits = int(max(1, min(splits, n_blocks)))
    kt = int(pl.cdiv(n_blocks, splits))

    if splits * kt == n_blocks:
        in_map = lambda c, k: (c * kt + k, 0)
    else:
        # Clamp the (at most splits-1) overflow blocks; the kernel skips them.
        in_map = lambda c, k: (jnp.minimum(c * kt + k, n_blocks - 1), 0)

    kernel = functools.partial(_rmse_partial_kernel, n_blocks=n_blocks,
                               valid_rows_last=valid_rows_last)

    n_valid = rows * cols
    cost = pl.CostEstimate(
        flops=3 * n_valid,
        transcendentals=0,
        bytes_accessed=n_valid * itemsize_pair + splits * 8 * cols * 4,
    )

    # Note: blocks are <= ~1 MiB per input, so the default scoped VMEM limit is
    # enough on all chips (no vmem_limit_bytes).  pipeline_mode=pl.Buffered(3)
    # on the in_specs is a possible few-% knob; left at the default depth of 2.
    return pl.pallas_call(
        kernel,
        out_shape=jax.ShapeDtypeStruct((splits, 8, cols), jnp.float32),
        grid_spec=pltpu.PrefetchScalarGridSpec(
            num_scalar_prefetch=0,
            grid=(splits, kt),
            in_specs=[
                pl.BlockSpec((block_rows, cols), in_map),
                pl.BlockSpec((block_rows, cols), in_map),
            ],
            out_specs=pl.BlockSpec((1, 8, cols), lambda c, k: (c, 0, 0)),
            scratch_shapes=[pltpu.VMEM((8, cols), jnp.float32)],
        ),
        compiler_params=pltpu.CompilerParams(
            dimension_semantics=("parallel", "arbitrary"),
        ),
        cost_estimate=cost,
    )(yhat2d, y2d)


def rmse_loss(yhat, y, coeff=1.0, block_rows=None, num_splits=None):
    """coeff * sqrt(mean((yhat - y)^2)) — matches torch.nn.MSELoss('mean')+sqrt."""
    assert yhat.shape == y.shape, "RMSELoss expects matching shapes"
    n_elems = int(yhat.size)
    assert n_elems > 0

    tail_sq = jnp.float32(0.0)
    yhat2d = y2d = None

    if yhat.ndim >= 2 and yhat.shape[-1] % _LANES == 0:
        cols = int(yhat.shape[-1])
        if 8 * cols * max(yhat.dtype.itemsize, y.dtype.itemsize) <= _MAX_BLOCK_BYTES:
            # Fast path: collapse leading dims only (free, layout-preserving).
            rows = n_elems // cols
            yhat2d = yhat.reshape(rows, cols)
            y2d = y.reshape(rows, cols)

    if yhat2d is None:
        # Generic path: flatten; the kernel covers the largest multiple of 128
        # elements, the <128-element ragged tail is summed with plain jnp (no
        # whole-array pad copy).
        yf = jnp.ravel(yhat)
        xf = jnp.ravel(y)
        rows = n_elems // _LANES
        main = rows * _LANES
        if main:
            yhat2d = yf[:main].reshape(rows, _LANES)
            y2d = xf[:main].reshape(rows, _LANES)
        if main < n_elems:
            dt = yf[main:].astype(jnp.float32) - xf[main:].astype(jnp.float32)
            tail_sq = jnp.sum(dt * dt)

    if yhat2d is None:
        total = tail_sq  # fewer than 128 elements: everything in the jnp tail
    else:
        partials = _partial_sq_sum(yhat2d, y2d, block_rows=block_rows,
                                   num_splits=num_splits)
        total = jnp.sum(partials) + tail_sq

    mse = total / jnp.float32(n_elems)
    return jnp.float32(coeff) * jnp.sqrt(mse)


if __name__ == "__main__":
    key = jax.random.PRNGKey(0)
    ks = jax.random.split(key, 8)
    coeff = 0.7

    def ref_rmse(a, b, c):
        d = a.astype(jnp.float32) - b.astype(jnp.float32)
        return c * jnp.sqrt(jnp.mean(d * d))

    # 1) NCHW-like (2,4,16,16) f32: lane-unfriendly last dim -> generic path,
    #    16 full rows of 128, single block, no tail.
    a1 = jax.random.normal(ks[0], (2, 4, 16, 16), dtype=jnp.float32)
    b1 = jax.random.normal(ks[1], (2, 4, 16, 16), dtype=jnp.float32)
    out1 = jax.block_until_ready(rmse_loss(a1, b1, coeff=coeff))
    ref1 = ref_rmse(a1, b1, coeff)
    assert jnp.allclose(out1, ref1, rtol=1e-5, atol=1e-6), (out1, ref1)

    # 2) Lane-friendly trailing dim (free collapse, no relayout): (50, 384)
    #    with a forced small block -> multi-block grid + partial (2-row) last
    #    block mask.
    a2 = jax.random.normal(ks[2], (50, 384), dtype=jnp.float32)
    b2 = jax.random.normal(ks[3], (50, 384), dtype=jnp.float32)
    out2 = jax.block_until_ready(rmse_loss(a2, b2, coeff=coeff, block_rows=16))
    ref2 = ref_rmse(a2, b2, coeff)
    assert jnp.allclose(out2, ref2, rtol=1e-5, atol=1e-6), (out2, ref2)

    # 3) Ragged element count (3*5*70 = 1050): 8 full rows through the kernel
    #    plus a 26-element jnp tail (no whole-array pad).
    a3 = jax.random.normal(ks[4], (3, 5, 70), dtype=jnp.float32)
    b3 = jax.random.normal(ks[5], (3, 5, 70), dtype=jnp.float32)
    out3 = jax.block_until_ready(rmse_loss(a3, b3, coeff=coeff))
    ref3 = ref_rmse(a3, b3, coeff)
    assert jnp.allclose(out3, ref3, rtol=1e-5, atol=1e-6), (out3, ref3)

    # 4) bf16, multi-block, forced 2-way split: exercises the clamped duplicate
    #    block, the garbage-row mask, and the in-kernel f32 upcast.
    a4 = jax.random.normal(ks[6], (4, 4, 32, 32), dtype=jnp.bfloat16)
    b4 = jax.random.normal(ks[7], (4, 4, 32, 32), dtype=jnp.bfloat16)
    out4 = jax.block_until_ready(
        rmse_loss(a4, b4, coeff=coeff, block_rows=48, num_splits=2))
    ref4 = ref_rmse(a4, b4, coeff)
    assert jnp.allclose(out4, ref4, rtol=1e-4, atol=1e-5), (out4, ref4)

    print("KERNEL_OK")
</pallas_src>

<mosaic_0001>
module attributes {stable_mosaic.version = 11 : i64} {
  func.func @_rmse_partial_kernel(%arg0: i32, %arg1: i32, %arg2: memref<16x128xf32, #tpu.memory_space<vmem>>, %arg3: memref<16x128xf32, #tpu.memory_space<vmem>>, %arg4: memref<1x8x128xf32, #tpu.memory_space<vmem>>, %arg5: memref<8x128xf32, #tpu.memory_space<vmem>>) attributes {dimension_semantics = [#tpu.dimension_semantics<parallel>, #tpu.dimension_semantics<arbitrary>], iteration_bounds = array<i64: 1, 1>, scalar_prefetch = 0 : i64, scratch_operands = 1 : i64, tpu.core_type = #tpu.core_type<tc>, window_params = [{transform_indices = @transform_0, window_bounds = array<i64: 16, 128>}, {transform_indices = @transform_1, window_bounds = array<i64: 16, 128>}, {transform_indices = @transform_2, window_bounds = array<i64: 1, 8, 128>}]} {
    %c1_i32 = arith.constant 1 : i32
    %0 = arith.muli %arg0, %c1_i32 : i32
    %1 = arith.addi %0, %arg1 : i32
    %c0_i32 = arith.constant 0 : i32
    %2 = arith.cmpi eq, %arg1, %c0_i32 : i32
    %3 = arith.extui %2 : i1 to i32
    %c0_i32_0 = arith.constant 0 : i32
    %4 = arith.cmpi ne, %3, %c0_i32_0 : i32
    scf.if %4 {
      %cst = arith.constant 0.000000e+00 : f32
      %11 = vector.broadcast %cst : f32 to vector<8x128xf32>
      %c0 = arith.constant 0 : index
      %c0_5 = arith.constant 0 : index
      %12 = vector.load %arg5[%c0, %c0_5] : memref<8x128xf32, #tpu.memory_space<vmem>>, vector<8x128xf32>
      tpu.vector_store %arg5[%c0, %c0_5], %11 {strides = array<i32>} : memref<8x128xf32, #tpu.memory_space<vmem>>, vector<8x128xf32>,
    } else {
    }
    %c1_i32_1 = arith.constant 1 : i32
    %5 = arith.cmpi slt, %1, %c1_i32_1 : i32
    %6 = arith.extui %5 : i1 to i32
    %c0_i32_2 = arith.constant 0 : i32
    %7 = arith.cmpi ne, %6, %c0_i32_2 : i32
    scf.if %7 {
      %c0 = arith.constant 0 : index
      %c0_5 = arith.constant 0 : index
      %11 = vector.load %arg2[%c0, %c0_5] : memref<16x128xf32, #tpu.memory_space<vmem>>, vector<16x128xf32>
      %c0_6 = arith.constant 0 : index
      %c0_7 = arith.constant 0 : index
      %12 = vector.load %arg3[%c0_6, %c0_7] : memref<16x128xf32, #tpu.memory_space<vmem>>, vector<16x128xf32>
      %13 = arith.subf %11, %12 : vector<16x128xf32>
      %14 = arith.mulf %13, %13 : vector<16x128xf32>
      %15 = vector.extract_strided_slice %14 {offsets = [0, 0], sizes = [8, 128], strides = [1, 1]} : vector<16x128xf32> to vector<8x128xf32>
      %16 = vector.extract_strided_slice %14 {offsets = [8, 0], sizes = [8, 128], strides = [1, 1]} : vector<16x128xf32> to vector<8x128xf32>
      %17 = arith.addf %15, %16 : vector<8x128xf32>
      %c0_8 = arith.constant 0 : index
      %c0_9 = arith.constant 0 : index
      %18 = vector.load %arg5[%c0_8, %c0_9] : memref<8x128xf32, #tpu.memory_space<vmem>>, vector<8x128xf32>
      %19 = arith.addf %18, %17 : vector<8x128xf32>
      %c0_10 = arith.constant 0 : index
      %c0_11 = arith.constant 0 : index
      %20 = vector.load %arg5[%c0_10, %c0_11] : memref<8x128xf32, #tpu.memory_space<vmem>>, vector<8x128xf32>
      tpu.vector_store %arg5[%c0_10, %c0_11], %19 {strides = array<i32>} : memref<8x128xf32, #tpu.memory_space<vmem>>, vector<8x128xf32>,
    } else {
    }
    %c0_i32_3 = arith.constant 0 : i32
    %8 = arith.cmpi eq, %arg1, %c0_i32_3 : i32
    %9 = arith.extui %8 : i1 to i32
    %c0_i32_4 = arith.constant 0 : i32
    %10 = arith.cmpi ne, %9, %c0_i32_4 : i32
    scf.if %10 {
      %c0 = arith.constant 0 : index
      %c0_5 = arith.constant 0 : index
      %11 = vector.load %arg5[%c0, %c0_5] : memref<8x128xf32, #tpu.memory_space<vmem>>, vector<8x128xf32>
      %12 = vector.shape_cast %11 : vector<8x128xf32> to vector<1x8x128xf32>
      %c0_6 = arith.constant 0 : index
      %c0_7 = arith.constant 0 : index
      %c0_8 = arith.constant 0 : index
      %13 = vector.load %arg4[%c0_6, %c0_7, %c0_8] : memref<1x8x128xf32, #tpu.memory_space<vmem>>, vector<1x8x128xf32>
      tpu.vector_store %arg4[%c0_6, %c0_7, %c0_8], %12 {strides = array<i32>} : memref<1x8x128xf32, #tpu.memory_space<vmem>>, vector<1x8x128xf32>,
    } else {
    }
    return
  }
  func.func @transform_0(%arg0: i32, %arg1: i32) -> (i32, i32) {
    %c1_i32 = arith.constant 1 : i32
    %0 = arith.muli %arg0, %c1_i32 : i32
    %1 = arith.addi %0, %arg1 : i32
    %c0_i32 = arith.constant 0 : i32
    %c0_i32_0 = arith.constant 0 : i32
    return %1, %c0_i32 : i32, i32
  }
  func.func @transform_1(%arg0: i32, %arg1: i32) -> (i32, i32) {
    %c1_i32 = arith.constant 1 : i32
    %0 = arith.muli %arg0, %c1_i32 : i32
    %1 = arith.addi %0, %arg1 : i32
    %c0_i32 = arith.constant 0 : i32
    %c0_i32_0 = arith.constant 0 : i32
    return %1, %c0_i32 : i32, i32
  }
  func.func @transform_2(%arg0: i32, %arg1: i32) -> (i32, i32, i32) {
    %c0_i32 = arith.constant 0 : i32
    %c0_i32_0 = arith.constant 0 : i32
    %c0_i32_1 = arith.constant 0 : i32
    return %arg0, %c0_i32, %c0_i32_0 : i32, i32, i32
  }
}

</mosaic_0001>

<bundles_post_ra>
// kernel: tpu_custom_call.1
= control target key start
LH: loop header
LB: loop body
LE: loop exit
PB: predicated region body
PF: predicated region fallthrough
CT: control target
= control target key end

     0   :  { %7 = vsyncpa [#allocation4], 0  ;;  %s213_s0 = inlined_call_operand.hbm [shape: f32[16,128], index: 0, kind: input, shape index: {}]   ;;  %s214_s1 = inlined_call_operand.hbm [shape: f32[16,128], index: 1, kind: input, shape index: {}]   ;;  %s215_s2 = inlined_call_operand.hbm [shape: f32[1,8,128], index: 2, kind: output, shape index: {}]  }
   0x1   :  { %8 = vsyncpa [#allocation7], 0 }
   0x2   :  { %9 = vsyncpa [#allocation5], 0  ;;  %s18_s11 = sshll.u32 %s213_s0, 4  ;;  %s184_s12 = smov [#allocation3]   ;;  %s19_s11 = int_to_ptr.hbm [resolvable:$true] %s18_s11 }
   0x3   :  { %s20_s13 = sshll.u32 %s184_s12, 4  ;;  %s35_s16 = sshll.u32 %s214_s1, 4  ;;  %s21_s13 = int_to_ptr.vmem [resolvable:$true] %s20_s13  ;;  %s36_s16 = int_to_ptr.hbm [resolvable:$true] %s35_s16 }
   0x4   :  { %s185_s17 = smov 128   ;;  %s186_s18 = smov 8  }
   0x5   :  { %26 = dma.hbm_to_vmem [thread:$0]  %s19_s11, 256, %s21_s13, [#allocation4], %s185_s17, %s185_s17, %s186_s18  }
   0x6   :  { %s187_s19 = smov [#allocation6]  }
   0x7   :  { %s37_s20 = sshll.u32 %s187_s19, 4  ;;  %s38_s20 = int_to_ptr.vmem [resolvable:$true] %s37_s20 }
   0x8   :  { %43 = dma.hbm_to_vmem [thread:$0]  %s36_s16, 256, %s38_s20, [#allocation7], %s185_s17, %s185_s17, %s186_s18  }
   0x9   :  { %178 = dma.done.wait [#allocation4], 256  }
   0xa   :  { %179 = vsyncadd [#allocation4], 4294967040 }
   0xb   :  { %180 = dma.done.wait [#allocation7], 256  }
   0xc   :  { %181 = vsyncadd [#allocation7], 4294967040  ;;  %v66_v0 = vld [vmem:[#allocation3] sm:$0xff]  ;;  %v67_v1 = vld [vmem:[#allocation3 + $0x8] sm:$0xff]  ;;  %s188_s0 = smov [#allocation8]   ;;  %s90_s23 = sshll.u32 %s215_s2, 4  ;;  %s91_s23 = int_to_ptr.hbm [resolvable:$true] %s90_s23 }
   0xd   :  { %v68_v2 = vld [vmem:[#allocation6] sm:$0xff]  ;;  %v69_v3 = vld [vmem:[#allocation6 + $0x8] sm:$0xff]  ;;  %s88_s1 = sshll.u32 %s188_s0, 4  ;;  %s89_s1 = int_to_ptr.vmem [resolvable:$true] %s88_s1 }
   0xe   :  { %v70_v4 = vsub.f32 %v66_v0, %v68_v2  ;;  %v71_v5 = vsub.f32 %v67_v1, %v69_v3 }
  0x10   :  { %v72_v6 = vmul.f32 %v70_v4, %v70_v4  ;;  %v73_v7 = vmul.f32 %v71_v5, %v71_v5 }
  0x12   :  { %v74_v8 = vadd.f32 %v73_v7, %v72_v6 }
  0x14   :  { %82 = vst [vmem:[#allocation8] sm:$0xff] %v74_v8 }
  0x15   :  { %93 = dma.vmem_to_hbm [thread:$0]  %s89_s1, 128, %s91_s23, [#allocation5]  }
  0x16   :  { %182 = dma.done.wait [#allocation5], 128  }
  0x17   :  { %183 = vsyncadd [#allocation5], 4294967168 }
  0x18   :  { %98 = vsyncpa [#allocation4], 1 }
  0x19   :  { %99 = vsyncpa [#allocation7], 1 }
  0x1a   :  { %100 = vsyncpa [#allocation5], 1 }

</bundles_post_ra>
